<compile_context>
chip_gen: v5e
topology: v5e:2x2
jax: 0.10.0
libtpu: 0.0.40
codegen_flags: <defaults>
</compile_context>

<pallas_src>
import functools
import math

import jax
import jax.numpy as jnp
from jax.experimental import pallas as pl
from jax.experimental.pallas import tpu as pltpu


# ----------------------------------------------------------------------------
# Kernel
# ----------------------------------------------------------------------------
def _value_critic_kernel(x_ref, *refs, n_hidden_layers):
    """Fused ValueCritic MLP forward, computed batch-on-lanes ("transposed").

    refs = (w0, b0, w1, b1, ..., w_last, b_last, out_ref)

    Layouts:
      x_ref   : (in_dim, batch_tile)  -- batch on lanes (pre-transposed in wrapper)
      w_l     : (fan_out, fan_in)     -- PyTorch nn.Linear weight layout
      b_l     : (fan_out, 1)
      w_last  : (hidden, 1)           -- final projection stored as a column
      b_last  : (1, 1)
      out_ref : (1, batch_tile)       -- batch on lanes -> lane-dense stores
    """
    out_ref = refs[-1]
    p = refs[:-1]

    h = x_ref[...]                                        # (in_dim, batch_tile)

    # Hidden layers: y = W @ h + b, ReLU.  Operands stay in the weight dtype
    # (bf16 hits full MXU rate on v6e/v7x); accumulation is f32 on the MXU.
    for layer in range(n_hidden_layers):
        w = p[2 * layer][...]                             # (fan_out, fan_in)
        b = p[2 * layer + 1][...]                         # (fan_out, 1)
        z = jnp.dot(w, h.astype(w.dtype),
                    preferred_element_type=jnp.float32)   # (fan_out, batch_tile) f32
        # Single fused epilogue: bias add + ReLU + one cast back to MXU dtype.
        h = jnp.maximum(z + b.astype(jnp.float32), 0.0).astype(w.dtype)

    # Final hidden -> 1 projection.  A width-1 MXU matmul would use 1/128 (or
    # 1/256) of the MXU and still pay push/drain latency, so do it on the VPU:
    # multiply in the operand dtype, accumulate the sublane reduce in f32.
    w_v = p[-2][...]                                      # (hidden, 1)
    b_v = p[-1][...]                                      # (1, 1)
    v = jnp.sum(h * w_v.astype(h.dtype), axis=0, keepdims=True,
                dtype=jnp.float32)                        # (1, batch_tile) f32
    out_ref[...] = (v + b_v.astype(jnp.float32)).astype(out_ref.dtype)


# ----------------------------------------------------------------------------
# Tiling / VMEM helpers
# ----------------------------------------------------------------------------
def _round_up(x, m):
    return ((x + m - 1) // m) * m


def _round_down(x, m):
    return (x // m) * m


def _vmem_budget_bytes():
    """Generation-aware (limit, budget): big tiles on 128 MiB parts, headroom on v7x."""
    try:
        cap = int(pltpu.get_tpu_info().vmem_capacity_bytes)
    except Exception:  # pragma: no cover - conservative default (v7x-sized)
        cap = 64 * 1024 * 1024
    if cap >= 96 * 1024 * 1024:          # v5e / v6e: 128 MiB physical VMEM
        limit = 100 * 1024 * 1024
    else:                                 # v7x: 64 MiB physical VMEM
        limit = 48 * 1024 * 1024
    return limit, limit - 8 * 1024 * 1024


def _pick_batch_tile(B, in_dim, layer_dims, itemsize, budget):
    """Largest 128-aligned batch tile that fits the VMEM budget and keeps >=4 tiles."""
    max_width = max(layer_dims)
    # Sublane granule for the parameter dtype: 8 rows (f32), 16 (bf16), 32 (int8/fp8).
    sub = max(1, 32 // (8 * itemsize)) * 8

    def pad(x, m):
        return _round_up(max(int(x), 1), m)

    # Weights/biases are single-buffered and VMEM-resident (constant index map).
    # Account for lane padding: a (fan_out, 1) bias really occupies 128 lanes.
    param_bytes = 0
    for fi, fo in zip(layer_dims[:-1], layer_dims[1:]):
        param_bytes += pad(fo, sub) * pad(fi, 128) * itemsize      # W
        param_bytes += pad(fo, sub) * 128 * itemsize               # b (lane-padded)

    def usage(bt):
        x_blocks = 2 * pad(in_dim, sub) * bt * itemsize            # double-buffered state tile
        out_blocks = 2 * 8 * bt * 4                                # (1, bt) out, sublane-padded
        acts = 3 * max_width * bt * 4                              # live f32 temporaries
        return param_bytes + x_blocks + out_blocks + acts

    B_pad = _round_up(B, 128)
    bt = min(2048, B_pad)
    # Keep >= 4 grid steps (>= 2 per TensorCore on v7x) whenever the batch allows;
    # fall back to >= 2 steps for mid-sized batches.
    if B_pad >= 4 * 128:
        bt = min(bt, max(128, _round_down(B_pad // 4, 128)))
    elif B_pad >= 2 * 128:
        bt = min(bt, max(128, _round_down(B_pad // 2, 128)))
    while bt > 128 and usage(bt) > budget:
        bt -= 128
    return bt


# ----------------------------------------------------------------------------
# Wrapper
# ----------------------------------------------------------------------------
def value_critic_forward(state, params, *, batch_tile=None):
    """Run the fused ValueCritic MLP kernel.

    state:  (B, in_dim)
    params: list of (W, b):
              hidden layers:  W (fan_out, fan_in), b (fan_out, 1)   [+ ReLU]
              final layer:    W (hidden, 1),       b (1, 1)
    Returns (B, 1) values (dtype follows `state`).
    """
    B, in_dim = state.shape
    assert len(params) >= 2, "expect at least one hidden layer + final projection"
    n_hidden_layers = len(params) - 1

    out_dtype = state.dtype
    param_dtype = params[0][0].dtype
    itemsize = jnp.dtype(param_dtype).itemsize
    dims = [in_dim] + [w.shape[0] for (w, _) in params[:-1]] + [1]

    vmem_limit, budget = _vmem_budget_bytes()
    if batch_tile is None:
        batch_tile = _pick_batch_tile(B, in_dim, dims, itemsize, budget)
    assert batch_tile % 128 == 0, "batch_tile must be a multiple of 128 (lane width)"

    # Hoisted layout change: one transpose + (intentional) dtype cast in the
    # wrapper makes the kernel's state block lane-dense and the MXU path pure
    # bf16 when the parameters are bf16.
    state_t = state.T.astype(param_dtype)                 # (in_dim, B)
    B_pad = _round_up(B, batch_tile)
    if B_pad != B:
        state_t = jnp.pad(state_t, ((0, 0), (0, B_pad - B)))
    num_tiles = B_pad // batch_tile

    flat_params = []
    for w, b in params:
        flat_params += [w, b]

    flops = 2 * B_pad * sum(fi * fo for fi, fo in zip(dims[:-1], dims[1:]))
    bytes_accessed = int(
        state_t.size * itemsize
        + sum(p.size * jnp.dtype(p.dtype).itemsize for p in flat_params)
        + B_pad * jnp.dtype(out_dtype).itemsize)

    kernel = functools.partial(_value_critic_kernel,
                               n_hidden_layers=n_hidden_layers)
    out_shape = jax.ShapeDtypeStruct((1, B_pad), out_dtype)
    # Lane-dense output: each grid step writes a (1, batch_tile) slab
    # (batch on lanes -> unmasked vector stores).
    out_specs = pl.BlockSpec((1, batch_tile), lambda i: (0, i))

    def launch(single_buffer_weights):
        in_specs = [pl.BlockSpec((in_dim, batch_tile), lambda i: (0, i))]
        for prm in flat_params:
            if single_buffer_weights:
                # Constant index map -> fetched once; single-buffer to halve
                # the VMEM reserved for the resident parameters.
                spec = pl.BlockSpec(prm.shape, lambda i: (0, 0),
                                    pipeline_mode=pl.Buffered(1))
            else:
                spec = pl.BlockSpec(prm.shape, lambda i: (0, 0))
            in_specs.append(spec)

        return pl.pallas_call(
            kernel,
            out_shape=out_shape,
            grid_spec=pltpu.PrefetchScalarGridSpec(
                num_scalar_prefetch=0,
                grid=(num_tiles,),
                in_specs=in_specs,
                out_specs=out_specs,
            ),
            compiler_params=pltpu.CompilerParams(
                # Batch axis is embarrassingly parallel -> shards across v7x's 2 TCs.
                dimension_semantics=("parallel",),
                vmem_limit_bytes=vmem_limit,
            ),
            cost_estimate=pl.CostEstimate(
                flops=flops, transcendentals=0, bytes_accessed=bytes_accessed),
        )(state_t, *flat_params)

    try:
        out = launch(single_buffer_weights=True)
    except Exception:
        # Fallback for jax builds without per-BlockSpec pipeline_mode support.
        out = launch(single_buffer_weights=False)

    return out[0, :B].reshape(B, 1)


# ----------------------------------------------------------------------------
# Params / reference
# ----------------------------------------------------------------------------
def init_value_critic_params(key, in_dim, hidden_dim, n_layers, dtype=jnp.float32):
    """Deterministic init matching PyTorch nn.Linear default U(-1/sqrt(fan_in), +).

    Layer structure (matching the unofficial-IQL MLP):
      Linear(in_dim, hidden) -> ReLU
      (n_layers - 1) x [Linear(hidden, hidden) -> ReLU]
      Linear(hidden, 1)

    Hidden weights are stored as (fan_out, fan_in) (PyTorch nn.Linear layout)
    with (fan_out, 1) biases; the final layer is stored as a (hidden, 1) column
    with a (1, 1) bias — exactly the layouts the kernel consumes.
    """
    dims = [in_dim] + [hidden_dim] * n_layers + [1]
    params = []
    n_total = len(dims) - 1
    for idx, (fan_in, fan_out) in enumerate(zip(dims[:-1], dims[1:])):
        key, kw, kb = jax.random.split(key, 3)
        bound = 1.0 / math.sqrt(fan_in)
        w = jax.random.uniform(kw, (fan_out, fan_in), jnp.float32, -bound, bound)
        b = jax.random.uniform(kb, (fan_out,), jnp.float32, -bound, bound)
        if idx == n_total - 1:                 # final hidden -> 1 projection
            w = w.T.reshape(fan_in, 1)         # (hidden, 1) column
            b = b.reshape(1, 1)
        else:
            b = b.reshape(fan_out, 1)
        params.append((w.astype(dtype), b.astype(dtype)))
    return params


def value_critic_ref(state, params):
    """Pure-JAX reference for correctness check (same param layouts)."""
    h = state
    for w, b in params[:-1]:                   # w: (out, in), b: (out, 1)
        h = jnp.maximum(h @ w.T + b[:, 0], 0.0)
    w, b = params[-1]                          # w: (hidden, 1), b: (1, 1)
    return h @ w + b


if __name__ == "__main__":
    key = jax.random.PRNGKey(0)

    # Small shapes consistent with a value critic on a flat state vector.
    B, in_dim, hidden_dim, n_layers = 8, 16, 32, 2

    k_state, k_params = jax.random.split(key)
    state = jax.random.normal(k_state, (B, in_dim), jnp.float32)
    params = init_value_critic_params(k_params, in_dim, hidden_dim, n_layers)

    out = value_critic_forward(state, params)
    out = jax.block_until_ready(out)

    ref = value_critic_ref(state, params)
    assert out.shape == (B, 1), out.shape
    assert jnp.allclose(out, ref, atol=1e-4, rtol=1e-4), (out, ref)

    print("KERNEL_OK")
</pallas_src>

<mosaic_0001>
module attributes {stable_mosaic.version = 11 : i64} {
  func.func @_value_critic_kernel(%arg0: i32, %arg1: memref<16x128xf32, #tpu.memory_space<vmem>>, %arg2: memref<32x16xf32, #tpu.memory_space<vmem>>, %arg3: memref<32x1xf32, #tpu.memory_space<vmem>>, %arg4: memref<32x32xf32, #tpu.memory_space<vmem>>, %arg5: memref<32x1xf32, #tpu.memory_space<vmem>>, %arg6: memref<32x1xf32, #tpu.memory_space<vmem>>, %arg7: memref<1x1xf32, #tpu.memory_space<vmem>>, %arg8: memref<1x128xf32, #tpu.memory_space<vmem>>) attributes {dimension_semantics = [#tpu.dimension_semantics<parallel>], iteration_bounds = array<i64: 1>, scalar_prefetch = 0 : i64, scratch_operands = 0 : i64, tpu.core_type = #tpu.core_type<tc>, window_params = [{transform_indices = @transform_0, window_bounds = array<i64: 16, 128>}, {pipeline_mode = #tpu.pipeline_mode<synchronous>, transform_indices = @transform_1, window_bounds = array<i64: 32, 16>}, {pipeline_mode = #tpu.pipeline_mode<synchronous>, transform_indices = @transform_2, window_bounds = array<i64: 32, 1>}, {pipeline_mode = #tpu.pipeline_mode<synchronous>, transform_indices = @transform_3, window_bounds = array<i64: 32, 32>}, {pipeline_mode = #tpu.pipeline_mode<synchronous>, transform_indices = @transform_4, window_bounds = array<i64: 32, 1>}, {pipeline_mode = #tpu.pipeline_mode<synchronous>, transform_indices = @transform_5, window_bounds = array<i64: 32, 1>}, {pipeline_mode = #tpu.pipeline_mode<synchronous>, transform_indices = @transform_6, window_bounds = array<i64: 1, 1>}, {transform_indices = @transform_7, window_bounds = array<i64: 1, 128>}]} {
    %c0 = arith.constant 0 : index
    %c0_0 = arith.constant 0 : index
    %0 = vector.load %arg1[%c0, %c0_0] : memref<16x128xf32, #tpu.memory_space<vmem>>, vector<16x128xf32>
    %c0_1 = arith.constant 0 : index
    %c0_2 = arith.constant 0 : index
    %1 = vector.load %arg2[%c0_1, %c0_2] : memref<32x16xf32, #tpu.memory_space<vmem>>, vector<32x16xf32>
    %c0_3 = arith.constant 0 : index
    %c0_4 = arith.constant 0 : index
    %2 = vector.load %arg3[%c0_3, %c0_4] : memref<32x1xf32, #tpu.memory_space<vmem>>, vector<32x1xf32>
    %cst = arith.constant dense<0.000000e+00> : vector<32x128xf32>
    %3 = tpu.matmul %1, %0, %cst {dimension_numbers = #tpu.dot_dimension_numbers<[1], [0], [0], [1], [0, 0, 1, 1], [], []>} : vector<32x16xf32>, vector<16x128xf32>, vector<32x128xf32> -> vector<32x128xf32>
    %4 = vector.broadcast %2 : vector<32x1xf32> to vector<32x128xf32>
    %5 = arith.addf %3, %4 : vector<32x128xf32>
    %cst_5 = arith.constant 0.000000e+00 : f32
    %6 = vector.broadcast %cst_5 : f32 to vector<32x128xf32>
    %7 = arith.maximumf %5, %6 : vector<32x128xf32>
    %c0_6 = arith.constant 0 : index
    %c0_7 = arith.constant 0 : index
    %8 = vector.load %arg4[%c0_6, %c0_7] : memref<32x32xf32, #tpu.memory_space<vmem>>, vector<32x32xf32>
    %c0_8 = arith.constant 0 : index
    %c0_9 = arith.constant 0 : index
    %9 = vector.load %arg5[%c0_8, %c0_9] : memref<32x1xf32, #tpu.memory_space<vmem>>, vector<32x1xf32>
    %cst_10 = arith.constant dense<0.000000e+00> : vector<32x128xf32>
    %10 = tpu.matmul %8, %7, %cst_10 {dimension_numbers = #tpu.dot_dimension_numbers<[1], [0], [0], [1], [0, 0, 1, 1], [], []>} : vector<32x32xf32>, vector<32x128xf32>, vector<32x128xf32> -> vector<32x128xf32>
    %11 = vector.broadcast %9 : vector<32x1xf32> to vector<32x128xf32>
    %12 = arith.addf %10, %11 : vector<32x128xf32>
    %cst_11 = arith.constant 0.000000e+00 : f32
    %13 = vector.broadcast %cst_11 : f32 to vector<32x128xf32>
    %14 = arith.maximumf %12, %13 : vector<32x128xf32>
    %c0_12 = arith.constant 0 : index
    %c0_13 = arith.constant 0 : index
    %15 = vector.load %arg6[%c0_12, %c0_13] : memref<32x1xf32, #tpu.memory_space<vmem>>, vector<32x1xf32>
    %c0_14 = arith.constant 0 : index
    %c0_15 = arith.constant 0 : index
    %16 = vector.load %arg7[%c0_14, %c0_15] : memref<1x1xf32, #tpu.memory_space<vmem>>, vector<1x1xf32>
    %17 = vector.broadcast %15 : vector<32x1xf32> to vector<32x128xf32>
    %18 = arith.mulf %14, %17 : vector<32x128xf32>
    %cst_16 = arith.constant dense<0.000000e+00> : vector<128xf32>
    %19 = vector.multi_reduction <add>, %18, %cst_16 [0] : vector<32x128xf32> to vector<128xf32>
    %20 = vector.shape_cast %19 : vector<128xf32> to vector<1x128xf32>
    %21 = vector.broadcast %16 : vector<1x1xf32> to vector<1x128xf32>
    %22 = arith.addf %20, %21 : vector<1x128xf32>
    %c0_17 = arith.constant 0 : index
    %c0_18 = arith.constant 0 : index
    %23 = vector.load %arg8[%c0_17, %c0_18] : memref<1x128xf32, #tpu.memory_space<vmem>>, vector<1x128xf32>
    tpu.vector_store %arg8[%c0_17, %c0_18], %22 {strides = array<i32>} : memref<1x128xf32, #tpu.memory_space<vmem>>, vector<1x128xf32>,
    return
  }
  func.func @transform_0(%arg0: i32) -> (i32, i32) {
    %c0_i32 = arith.constant 0 : i32
    %c0_i32_0 = arith.constant 0 : i32
    return %c0_i32, %arg0 : i32, i32
  }
  func.func @transform_1(%arg0: i32) -> (i32, i32) {
    %c0_i32 = arith.constant 0 : i32
    %c0_i32_0 = arith.constant 0 : i32
    %c0_i32_1 = arith.constant 0 : i32
    return %c0_i32, %c0_i32_0 : i32, i32
  }
  func.func @transform_2(%arg0: i32) -> (i32, i32) {
    %c0_i32 = arith.constant 0 : i32
    %c0_i32_0 = arith.constant 0 : i32
    %c0_i32_1 = arith.constant 0 : i32
    return %c0_i32, %c0_i32_0 : i32, i32
  }
  func.func @transform_3(%arg0: i32) -> (i32, i32) {
    %c0_i32 = arith.constant 0 : i32
    %c0_i32_0 = arith.constant 0 : i32
    %c0_i32_1 = arith.constant 0 : i32
    return %c0_i32, %c0_i32_0 : i32, i32
  }
  func.func @transform_4(%arg0: i32) -> (i32, i32) {
    %c0_i32 = arith.constant 0 : i32
    %c0_i32_0 = arith.constant 0 : i32
    %c0_i32_1 = arith.constant 0 : i32
    return %c0_i32, %c0_i32_0 : i32, i32
  }
  func.func @transform_5(%arg0: i32) -> (i32, i32) {
    %c0_i32 = arith.constant 0 : i32
    %c0_i32_0 = arith.constant 0 : i32
    %c0_i32_1 = arith.constant 0 : i32
    return %c0_i32, %c0_i32_0 : i32, i32
  }
  func.func @transform_6(%arg0: i32) -> (i32, i32) {
    %c0_i32 = arith.constant 0 : i32
    %c0_i32_0 = arith.constant 0 : i32
    %c0_i32_1 = arith.constant 0 : i32
    return %c0_i32, %c0_i32_0 : i32, i32
  }
  func.func @transform_7(%arg0: i32) -> (i32, i32) {
    %c0_i32 = arith.constant 0 : i32
    %c0_i32_0 = arith.constant 0 : i32
    return %c0_i32, %arg0 : i32, i32
  }
}

module attributes {stable_mosaic.version = 11 : i64} {
  func.func @_value_critic_kernel(%arg0: i32, %arg1: memref<16x128xf32, #tpu.memory_space<vmem>>, %arg2: memref<32x16xf32, #tpu.memory_space<vmem>>, %arg3: memref<32x1xf32, #tpu.memory_space<vmem>>, %arg4: memref<32x32xf32, #tpu.memory_space<vmem>>, %arg5: memref<32x1xf32, #tpu.memory_space<vmem>>, %arg6: memref<32x1xf32, #tpu.memory_space<vmem>>, %arg7: memref<1x1xf32, #tpu.memory_space<vmem>>, %arg8: memref<1x128xf32, #tpu.memory_space<vmem>>) attributes {dimension_semantics = [#tpu.dimension_semantics<parallel>], iteration_bounds = array<i64: 1>, scalar_prefetch = 0 : i64, scratch_operands = 0 : i64, tpu.core_type = #tpu.core_type<tc>, window_params = [{transform_indices = @transform_0, window_bounds = array<i64: 16, 128>}, {pipeline_mode = #tpu.pipeline_mode<synchronous>, transform_indices = @transform_1, window_bounds = array<i64: 32, 16>}, {pipeline_mode = #tpu.pipeline_mode<synchronous>, transform_indices = @transform_2, window_bounds = array<i64: 32, 1>}, {pipeline_mode = #tpu.pipeline_mode<synchronous>, transform_indices = @transform_3, window_bounds = array<i64: 32, 32>}, {pipeline_mode = #tpu.pipeline_mode<synchronous>, transform_indices = @transform_4, window_bounds = array<i64: 32, 1>}, {pipeline_mode = #tpu.pipeline_mode<synchronous>, transform_indices = @transform_5, window_bounds = array<i64: 32, 1>}, {pipeline_mode = #tpu.pipeline_mode<synchronous>, transform_indices = @transform_6, window_bounds = array<i64: 1, 1>}, {transform_indices = @transform_7, window_bounds = array<i64: 1, 128>}]} {
    %c0 = arith.constant 0 : index
    %c0_0 = arith.constant 0 : index
    %0 = vector.load %arg1[%c0, %c0_0] : memref<16x128xf32, #tpu.memory_space<vmem>>, vector<16x128xf32>
    %c0_1 = arith.constant 0 : index
    %c0_2 = arith.constant 0 : index
    %1 = vector.load %arg2[%c0_1, %c0_2] : memref<32x16xf32, #tpu.memory_space<vmem>>, vector<32x16xf32>
    %c0_3 = arith.constant 0 : index
    %c0_4 = arith.constant 0 : index
    %2 = vector.load %arg3[%c0_3, %c0_4] : memref<32x1xf32, #tpu.memory_space<vmem>>, vector<32x1xf32>
    %cst = arith.constant dense<0.000000e+00> : vector<32x128xf32>
    %3 = tpu.matmul %1, %0, %cst {dimension_numbers = #tpu.dot_dimension_numbers<[1], [0], [0], [1], [0, 0, 1, 1], [], []>} : vector<32x16xf32>, vector<16x128xf32>, vector<32x128xf32> -> vector<32x128xf32>
    %4 = vector.broadcast %2 : vector<32x1xf32> to vector<32x128xf32>
    %5 = arith.addf %3, %4 : vector<32x128xf32>
    %cst_5 = arith.constant 0.000000e+00 : f32
    %6 = vector.broadcast %cst_5 : f32 to vector<32x128xf32>
    %7 = arith.maximumf %5, %6 : vector<32x128xf32>
    %c0_6 = arith.constant 0 : index
    %c0_7 = arith.constant 0 : index
    %8 = vector.load %arg4[%c0_6, %c0_7] : memref<32x32xf32, #tpu.memory_space<vmem>>, vector<32x32xf32>
    %c0_8 = arith.constant 0 : index
    %c0_9 = arith.constant 0 : index
    %9 = vector.load %arg5[%c0_8, %c0_9] : memref<32x1xf32, #tpu.memory_space<vmem>>, vector<32x1xf32>
    %cst_10 = arith.constant dense<0.000000e+00> : vector<32x128xf32>
    %10 = tpu.matmul %8, %7, %cst_10 {dimension_numbers = #tpu.dot_dimension_numbers<[1], [0], [0], [1], [0, 0, 1, 1], [], []>} : vector<32x32xf32>, vector<32x128xf32>, vector<32x128xf32> -> vector<32x128xf32>
    %11 = vector.broadcast %9 : vector<32x1xf32> to vector<32x128xf32>
    %12 = arith.addf %10, %11 : vector<32x128xf32>
    %cst_11 = arith.constant 0.000000e+00 : f32
    %13 = vector.broadcast %cst_11 : f32 to vector<32x128xf32>
    %14 = arith.maximumf %12, %13 : vector<32x128xf32>
    %c0_12 = arith.constant 0 : index
    %c0_13 = arith.constant 0 : index
    %15 = vector.load %arg6[%c0_12, %c0_13] : memref<32x1xf32, #tpu.memory_space<vmem>>, vector<32x1xf32>
    %c0_14 = arith.constant 0 : index
    %c0_15 = arith.constant 0 : index
    %16 = vector.load %arg7[%c0_14, %c0_15] : memref<1x1xf32, #tpu.memory_space<vmem>>, vector<1x1xf32>
    %17 = vector.broadcast %15 : vector<32x1xf32> to vector<32x128xf32>
    %18 = arith.mulf %14, %17 : vector<32x128xf32>
    %cst_16 = arith.constant dense<0.000000e+00> : vector<128xf32>
    %19 = vector.multi_reduction <add>, %18, %cst_16 [0] : vector<32x128xf32> to vector<128xf32>
    %20 = vector.shape_cast %19 : vector<128xf32> to vector<1x128xf32>
    %21 = vector.broadcast %16 : vector<1x1xf32> to vector<1x128xf32>
    %22 = arith.addf %20, %21 : vector<1x128xf32>
    %c0_17 = arith.constant 0 : index
    %c0_18 = arith.constant 0 : index
    %23 = vector.load %arg8[%c0_17, %c0_18] : memref<1x128xf32, #tpu.memory_space<vmem>>, vector<1x128xf32>
    tpu.vector_store %arg8[%c0_17, %c0_18], %22 {strides = array<i32>} : memref<1x128xf32, #tpu.memory_space<vmem>>, vector<1x128xf32>,
    return
  }
  func.func @transform_0(%arg0: i32) -> (i32, i32) {
    %c0_i32 = arith.constant 0 : i32
    %c0_i32_0 = arith.constant 0 : i32
    return %c0_i32, %arg0 : i32, i32
  }
  func.func @transform_1(%arg0: i32) -> (i32, i32) {
    %c0_i32 = arith.constant 0 : i32
    %c0_i32_0 = arith.constant 0 : i32
    %c0_i32_1 = arith.constant 0 : i32
    return %c0_i32, %c0_i32_0 : i32, i32
  }
  func.func @transform_2(%arg0: i32) -> (i32, i32) {
    %c0_i32 = arith.constant 0 : i32
    %c0_i32_0 = arith.constant 0 : i32
    %c0_i32_1 = arith.constant 0 : i32
    return %c0_i32, %c0_i32_0 : i32, i32
  }
  func.func @transform_3(%arg0: i32) -> (i32, i32) {
    %c0_i32 = arith.constant 0 : i32
    %c0_i32_0 = arith.constant 0 : i32
    %c0_i32_1 = arith.constant 0 : i32
    return %c0_i32, %c0_i32_0 : i32, i32
  }
  func.func @transform_4(%arg0: i32) -> (i32, i32) {
    %c0_i32 = arith.constant 0 : i32
    %c0_i32_0 = arith.constant 0 : i32
    %c0_i32_1 = arith.constant 0 : i32
    return %c0_i32, %c0_i32_0 : i32, i32
  }
  func.func @transform_5(%arg0: i32) -> (i32, i32) {
    %c0_i32 = arith.constant 0 : i32
    %c0_i32_0 = arith.constant 0 : i32
    %c0_i32_1 = arith.constant 0 : i32
    return %c0_i32, %c0_i32_0 : i32, i32
  }
  func.func @transform_6(%arg0: i32) -> (i32, i32) {
    %c0_i32 = arith.constant 0 : i32
    %c0_i32_0 = arith.constant 0 : i32
    %c0_i32_1 = arith.constant 0 : i32
    return %c0_i32, %c0_i32_0 : i32, i32
  }
  func.func @transform_7(%arg0: i32) -> (i32, i32) {
    %c0_i32 = arith.constant 0 : i32
    %c0_i32_0 = arith.constant 0 : i32
    return %c0_i32, %arg0 : i32, i32
  }
}

</mosaic_0001>

<bundles_post_ra>
// kernel: tpu_custom_call.1
= control target key start
LH: loop header
LB: loop body
LE: loop exit
PB: predicated region body
PF: predicated region fallthrough
CT: control target
= control target key end

     0   :  { %s404_s0 = inlined_call_operand.vmem [shape: f32[16,128], index: 0, kind: input, shape index: {}]   ;;  %s405_s1 = inlined_call_operand.vmem [shape: f32[32,16], index: 1, kind: input, shape index: {}]   ;;  %s406_s2 = inlined_call_operand.vmem [shape: f32[32,1], index: 2, kind: input, shape index: {}]   ;;  %s407_s3 = inlined_call_operand.vmem [shape: f32[32,32], index: 3, kind: input, shape index: {}]   ;;  %s408_s4 = inlined_call_operand.vmem [shape: f32[32,1], index: 4, kind: input, shape index: {}]   ;;  %s409_s5 = inlined_call_operand.vmem [shape: f32[32,1], index: 5, kind: input, shape index: {}]   ;;  %s410_s6 = inlined_call_operand.<no memory space> [shape: f32[1,1], index: 6, kind: input, shape index: {}]   ;;  %s411_s7 = inlined_call_operand.hbm [shape: f32[1,128], index: 7, kind: output, shape index: {}]  }
   0x1   :  { %v12_v0 = vstv %s410_s6 }
   0x2   :  { %13 = vst [vmem:[#allocation2] sm:$0x1] %v12_v0 }
   0x3   :  { %v30_v1 = vld [vmem:[%s404_s0 + $0x8] sm:$0xff]  ;;  %v38_v2 = vld [vmem:[%s406_s2 + $0x18] sm:$0xff]  ;;  %v29_v3 = vld [vmem:[%s404_s0] sm:$0xff]  ;;  %v286_v4 = vmov 0   ;;  %vm59_vm0 = vcmask 130048  }
   0x4   :  { %257 = vset.pattern.permute.xlu0 %v286_v4  ;;  %249 = vmatpush.msra.mxu3 %v30_v1  ;;  %v32_v5 = vld [vmem:[%s405_s1 + $0x8] sm:$0xff]  ;;  %v31_v7 = vld [vmem:[%s405_s1] sm:$0xff] }
   0x5   :  { %v36_v6 = vld [vmem:[%s406_s2 + $0x8] sm:$0xff]  ;;  %56 = vperm.xlu0 %257, %v38_v2   ;;  %258 = vset.pattern.permute.xlu1 %v286_v4 }
   0x6   :  { %250 = vmatpush.msra.mxu3 %v29_v3  ;;  %46 = vperm.xlu1 %258, %v36_v6  }
   0x7   :  { %242 = vmatmul.msk.f32.vlgmr.msra.gmra.mxu3 %vm59_vm0, %v32_v5  ;;  %86 = vmatpush.msra.mxu0 %v30_v1 }
   0x8   :  { %259 = vset.pattern.permute.xlu2 %v286_v4 }
   0x9   :  { %14 = vsyncpa [#allocation4], 0  ;;  %87 = vmatpush.msra.mxu0 %v29_v3  ;;  %v37_v8 = vld [vmem:[%s406_s2 + $0x10] sm:$0xff]  ;;  %v35_v9 = vld [vmem:[%s406_s2] sm:$0xff]  ;;  %vm133_vm1 = vcmask 261120   ;;  %s232_s19 = sshll.u32 %s411_s7, 4  ;;  %s233_s19 = int_to_ptr.hbm [resolvable:$true] %s232_s19 }
   0xa   :  { %241 = vmatmul.msk.f32.vlgmr.msra.gmra.mxu0 %vm59_vm0, %v31_v7  ;;  %v33_v10 = vld [vmem:[%s405_s1 + $0x10] sm:$0xff]  ;;  %v112_v12 = vld [vmem:[%s408_s4 + $0x18] sm:$0xff]  ;;  %v180_v14 = vld [vmem:[%s409_s5 + $0x8] sm:$0xff] }
   0xb   :  { %v111_v11 = vld [vmem:[%s408_s4 + $0x10] sm:$0xff]  ;;  %v34_v13 = vld [vmem:[%s405_s1 + $0x18] sm:$0xff]  ;;  %v183_v16 = vld [vmem:[#allocation2] sm:$0x1] }
   0xc   :  { %v181_v15 = vld [vmem:[%s409_s5 + $0x10] sm:$0xff]  ;;  %v109_v17 = vld [vmem:[%s408_s4] sm:$0xff]  ;;  %v110_v19 = vld [vmem:[%s408_s4 + $0x8] sm:$0xff] }
   0xd   :  { %51 = vperm.xlu0 %257, %v37_v8   ;;  %115 = vperm.xlu2 %259, %v109_v17   ;;  %v179_v23 = vld [vmem:[%s409_s5] sm:$0xff]  ;;  %v182_v31 = vld [vmem:[%s409_s5 + $0x18] sm:$0xff]  ;;  %v107_v38 = vld [vmem:[%s407_s3 + $0x10] sm:$0xff] }
   0xe   :  { %41 = vperm.xlu1 %258, %v35_v9   ;;  %v105_v37 = vld [vmem:[%s407_s3] sm:$0xff]  ;;  %v106_v39 = vld [vmem:[%s407_s3 + $0x8] sm:$0xff]  ;;  %v108_v40 = vld [vmem:[%s407_s3 + $0x18] sm:$0xff]  ;;  %s287_s3 = smov [#allocation3]  }
   0xf   :  { %243 = vmatmul.msk.f32.gmra.mxu3 %vm59_vm0, %v33_v10  ;;  %s230_s16 = sshll.u32 %s287_s3, 4  ;;  %s231_s16 = int_to_ptr.vmem [resolvable:$true] %s230_s16 }
  0x15   :  { %125 = vperm.xlu0 %257, %v111_v11   ;;  %120 = vperm.xlu2 %259, %v110_v19  }
  0x16   :  { %130 = vperm.xlu1 %258, %v112_v12  }
  0x17   :  { %244 = vmatmul.msk.f32.gmra.mxu3 %vm59_vm0, %v34_v13 }
  0x1d   :  { %191 = vperm.xlu0 %257, %v180_v14   ;;  %186 = vperm.xlu2 %259, %v179_v23  }
  0x1e   :  { %196 = vperm.xlu1 %258, %v181_v15  }
  0x25   :  { %219 = vperm.xlu0 %257, %v183_v16   ;;  %201 = vperm.xlu2 %259, %v182_v31  }
  0x67   :  { %v116_v41 = vpop.permute.xlu2 %115 }
  0x6f   :  { %v121_v42 = vpop.permute.xlu2 %120 }
  0x77   :  { %v57_v20 = vpop.permute.xlu0 %56  ;;  %v187_v48 = vpop.permute.xlu2 %186 }
  0x78   :  { %v47_v22 = vpop.permute.xlu1 %46 }
  0x7f   :  { %v52_v24 = vpop.permute.xlu0 %51  ;;  %v202_v0 = vpop.permute.xlu2 %201 }
  0x80   :  { %v42_v32 = vpop.permute.xlu1 %41 }
  0x87   :  { %v89_v28 = vpop.f32.mrf.mxu0  ;;  %v126_v44 = vpop.permute.xlu0 %125 }
  0x88   :  { %v90_v34 = vadd.f32 %v89_v28, %v42_v32  ;;  %v131_v46 = vpop.permute.xlu1 %130 }
  0x8a   :  { %v92_v18 = vpop.f32.mrf.mxu3  ;;  %v101_v36 = vmax.f32 %v90_v34, 0.0 }
  0x8b   :  { %v93_v29 = vadd.f32 %v92_v18, %v47_v22 }
  0x8d   :  { %v102_v35 = vmax.f32 %v93_v29, 0.0 }
  0x8f   :  { %v192_v54 = vpop.permute.xlu0 %191 }
  0x90   :  { %v197_v61 = vpop.permute.xlu1 %196 }
  0x92   :  { %v95_v21 = vpop.f32.mrf.mxu3 }
  0x93   :  { %v96_v26 = vadd.f32 %v95_v21, %v52_v24 }
  0x95   :  { %v103_v33 = vmax.f32 %v96_v26, 0.0 }
  0x97   :  { %v220_v8 = vpop.permute.xlu0 %219 }
  0x98   :  { %v222_v10 = vperm.slane %v220_v8, 0 }
  0x9a   :  { %v98_v25 = vpop.f32.mrf.mxu3 }
  0x9b   :  { %v99_v27 = vadd.f32 %v98_v25, %v57_v20 }
  0x9d   :  { %v104_v30 = vmax.f32 %v99_v27, 0.0 }
  0x9f   :  { %158 = vmatpush.msra.mxu1 %v104_v30  ;;  %251 = vmatpush.msra.mxu2 %v104_v30 }
  0xa1   :  { %159 = vmatpush.msra.mxu1 %v103_v33  ;;  %252 = vmatpush.msra.mxu2 %v103_v33 }
  0xa3   :  { %160 = vmatpush.msra.mxu1 %v102_v35  ;;  %253 = vmatpush.msra.mxu2 %v102_v35 }
  0xa5   :  { %161 = vmatpush.msra.mxu1 %v101_v36  ;;  %254 = vmatpush.msra.mxu2 %v101_v36 }
  0xa6   :  { %245 = vmatmul.msk.f32.vlgmr.msra.gmra.mxu1 %vm133_vm1, %v105_v37  ;;  %247 = vmatmul.msk.f32.vlgmr.msra.gmra.mxu2 %vm133_vm1, %v107_v38 }
  0xae   :  { %246 = vmatmul.msk.f32.gmra.mxu1 %vm133_vm1, %v106_v39  ;;  %248 = vmatmul.msk.f32.gmra.mxu2 %vm133_vm1, %v108_v40 }
 0x123   :  { %v163_v43 = vpop.f32.mrf.mxu1 }
 0x124   :  { %v164_v45 = vadd.f32 %v163_v43, %v116_v41 }
 0x126   :  { %v175_v50 = vmax.f32 %v164_v45, 0.0 }
 0x128   :  { %v204_v55 = vmul.f32 %v187_v48, %v175_v50 }
 0x129   :  { %v169_v47 = vpop.f32.mrf.mxu2 }
 0x12a   :  { %v170_v51 = vadd.f32 %v169_v47, %v126_v44 }
 0x12b   :  { %v166_v49 = vpop.f32.mrf.mxu1 }
 0x12c   :  { %v167_v52 = vadd.f32 %v166_v49, %v121_v42  ;;  %v177_v56 = vmax.f32 %v170_v51, 0.0 }
 0x12e   :  { %v176_v53 = vmax.f32 %v167_v52, 0.0  ;;  %v206_v62 = vmul.f32 %v197_v61, %v177_v56 }
 0x130   :  { %v205_v57 = vmul.f32 %v192_v54, %v176_v53 }
 0x131   :  { %v172_v58 = vpop.f32.mrf.mxu2 }
 0x132   :  { %v208_v59 = vadd.f32 %v205_v57, %v204_v55  ;;  %v173_v60 = vadd.f32 %v172_v58, %v131_v46 }
 0x134   :  { %v178_v63 = vmax.f32 %v173_v60, 0.0  ;;  %v209_v2 = vadd.f32 %v208_v59, %v206_v62 }
 0x136   :  { %v207_v1 = vmul.f32 %v202_v0, %v178_v63 }
 0x138   :  { %v210_v3 = vadd.f32 %v209_v2, %v207_v1 }
 0x13a   :  { %v211_v4 = vrot.slane %v210_v3, 4 }
 0x13c   :  { %v212_v5 = vadd.f32 %v211_v4, %v210_v3 }
 0x13e   :  { %v213_v6 = vrot.slane %v212_v5, 2 }
 0x140   :  { %v214_v7 = vadd.f32 %v213_v6, %v212_v5 }
 0x142   :  { %v215_v9 = vrot.slane %v214_v7, 1 }
 0x144   :  { %v216_v11 = vadd.f32 %v215_v9, %v214_v7 }
 0x146   :  { %v223_v12 = vadd.f32 %v222_v10, %v216_v11 }
 0x148   :  { %224 = vst [vmem:[#allocation3] sm:$0x1] %v223_v12 }
 0x149   :  { %235 = dma.vmem_to_hbm [thread:$0]  %s231_s16, 16, %s233_s19, [#allocation4]  }
 0x14a   :  { %284 = dma.done.wait [#allocation4], 16  }
 0x14b   :  { %285 = vsyncadd [#allocation4], 4294967280 }
 0x14c   :  { %240 = vsyncpa [#allocation4], 1 }

// kernel: tpu_custom_call.1
= control target key start
LH: loop header
LB: loop body
LE: loop exit
PB: predicated region body
PF: predicated region fallthrough
CT: control target
= control target key end

     0   :  { %s404_s0 = inlined_call_operand.vmem [shape: f32[16,128], index: 0, kind: input, shape index: {}]   ;;  %s405_s1 = inlined_call_operand.vmem [shape: f32[32,16], index: 1, kind: input, shape index: {}]   ;;  %s406_s2 = inlined_call_operand.vmem [shape: f32[32,1], index: 2, kind: input, shape index: {}]   ;;  %s407_s3 = inlined_call_operand.vmem [shape: f32[32,32], index: 3, kind: input, shape index: {}]   ;;  %s408_s4 = inlined_call_operand.vmem [shape: f32[32,1], index: 4, kind: input, shape index: {}]   ;;  %s409_s5 = inlined_call_operand.vmem [shape: f32[32,1], index: 5, kind: input, shape index: {}]   ;;  %s410_s6 = inlined_call_operand.<no memory space> [shape: f32[1,1], index: 6, kind: input, shape index: {}]   ;;  %s411_s7 = inlined_call_operand.hbm [shape: f32[1,128], index: 7, kind: output, shape index: {}]  }
   0x1   :  { %v12_v0 = vstv %s410_s6 }
   0x2   :  { %13 = vst [vmem:[#allocation2] sm:$0x1] %v12_v0 }
   0x3   :  { %v30_v1 = vld [vmem:[%s404_s0 + $0x8] sm:$0xff]  ;;  %v38_v2 = vld [vmem:[%s406_s2 + $0x18] sm:$0xff]  ;;  %v29_v3 = vld [vmem:[%s404_s0] sm:$0xff]  ;;  %v286_v4 = vmov 0   ;;  %vm59_vm0 = vcmask 130048  }
   0x4   :  { %257 = vset.pattern.permute.xlu0 %v286_v4  ;;  %249 = vmatpush.msra.mxu3 %v30_v1  ;;  %v32_v5 = vld [vmem:[%s405_s1 + $0x8] sm:$0xff]  ;;  %v31_v7 = vld [vmem:[%s405_s1] sm:$0xff] }
   0x5   :  { %v36_v6 = vld [vmem:[%s406_s2 + $0x8] sm:$0xff]  ;;  %56 = vperm.xlu0 %257, %v38_v2   ;;  %258 = vset.pattern.permute.xlu1 %v286_v4 }
   0x6   :  { %250 = vmatpush.msra.mxu3 %v29_v3  ;;  %46 = vperm.xlu1 %258, %v36_v6  }
   0x7   :  { %242 = vmatmul.msk.f32.vlgmr.msra.gmra.mxu3 %vm59_vm0, %v32_v5  ;;  %86 = vmatpush.msra.mxu0 %v30_v1 }
   0x8   :  { %259 = vset.pattern.permute.xlu2 %v286_v4 }
   0x9   :  { %14 = vsyncpa [#allocation4], 0  ;;  %87 = vmatpush.msra.mxu0 %v29_v3  ;;  %v37_v8 = vld [vmem:[%s406_s2 + $0x10] sm:$0xff]  ;;  %v35_v9 = vld [vmem:[%s406_s2] sm:$0xff]  ;;  %vm133_vm1 = vcmask 261120   ;;  %s232_s19 = sshll.u32 %s411_s7, 4  ;;  %s233_s19 = int_to_ptr.hbm [resolvable:$true] %s232_s19 }
   0xa   :  { %241 = vmatmul.msk.f32.vlgmr.msra.gmra.mxu0 %vm59_vm0, %v31_v7  ;;  %v33_v10 = vld [vmem:[%s405_s1 + $0x10] sm:$0xff]  ;;  %v112_v12 = vld [vmem:[%s408_s4 + $0x18] sm:$0xff]  ;;  %v180_v14 = vld [vmem:[%s409_s5 + $0x8] sm:$0xff] }
   0xb   :  { %v111_v11 = vld [vmem:[%s408_s4 + $0x10] sm:$0xff]  ;;  %v34_v13 = vld [vmem:[%s405_s1 + $0x18] sm:$0xff]  ;;  %v183_v16 = vld [vmem:[#allocation2] sm:$0x1] }
   0xc   :  { %v181_v15 = vld [vmem:[%s409_s5 + $0x10] sm:$0xff]  ;;  %v109_v17 = vld [vmem:[%s408_s4] sm:$0xff]  ;;  %v110_v19 = vld [vmem:[%s408_s4 + $0x8] sm:$0xff] }
   0xd   :  { %51 = vperm.xlu0 %257, %v37_v8   ;;  %115 = vperm.xlu2 %259, %v109_v17   ;;  %v179_v23 = vld [vmem:[%s409_s5] sm:$0xff]  ;;  %v182_v31 = vld [vmem:[%s409_s5 + $0x18] sm:$0xff]  ;;  %v107_v38 = vld [vmem:[%s407_s3 + $0x10] sm:$0xff] }
   0xe   :  { %41 = vperm.xlu1 %258, %v35_v9   ;;  %v105_v37 = vld [vmem:[%s407_s3] sm:$0xff]  ;;  %v106_v39 = vld [vmem:[%s407_s3 + $0x8] sm:$0xff]  ;;  %v108_v40 = vld [vmem:[%s407_s3 + $0x18] sm:$0xff]  ;;  %s287_s3 = smov [#allocation3]  }
   0xf   :  { %243 = vmatmul.msk.f32.gmra.mxu3 %vm59_vm0, %v33_v10  ;;  %s230_s16 = sshll.u32 %s287_s3, 4  ;;  %s231_s16 = int_to_ptr.vmem [resolvable:$true] %s230_s16 }
  0x15   :  { %125 = vperm.xlu0 %257, %v111_v11   ;;  %120 = vperm.xlu2 %259, %v110_v19  }
  0x16   :  { %130 = vperm.xlu1 %258, %v112_v12  }
  0x17   :  { %244 = vmatmul.msk.f32.gmra.mxu3 %vm59_vm0, %v34_v13 }
  0x1d   :  { %191 = vperm.xlu0 %257, %v180_v14   ;;  %186 = vperm.xlu2 %259, %v179_v23  }
  0x1e   :  { %196 = vperm.xlu1 %258, %v181_v15  }
  0x25   :  { %219 = vperm.xlu0 %257, %v183_v16   ;;  %201 = vperm.xlu2 %259, %v182_v31  }
  0x67   :  { %v116_v41 = vpop.permute.xlu2 %115 }
  0x6f   :  { %v121_v42 = vpop.permute.xlu2 %120 }
  0x77   :  { %v57_v20 = vpop.permute.xlu0 %56  ;;  %v187_v48 = vpop.permute.xlu2 %186 }
  0x78   :  { %v47_v22 = vpop.permute.xlu1 %46 }
  0x7f   :  { %v52_v24 = vpop.permute.xlu0 %51  ;;  %v202_v0 = vpop.permute.xlu2 %201 }
  0x80   :  { %v42_v32 = vpop.permute.xlu1 %41 }
  0x87   :  { %v89_v28 = vpop.f32.mrf.mxu0  ;;  %v126_v44 = vpop.permute.xlu0 %125 }
  0x88   :  { %v90_v34 = vadd.f32 %v89_v28, %v42_v32  ;;  %v131_v46 = vpop.permute.xlu1 %130 }
  0x8a   :  { %v92_v18 = vpop.f32.mrf.mxu3  ;;  %v101_v36 = vmax.f32 %v90_v34, 0.0 }
  0x8b   :  { %v93_v29 = vadd.f32 %v92_v18, %v47_v22 }
  0x8d   :  { %v102_v35 = vmax.f32 %v93_v29, 0.0 }
  0x8f   :  { %v192_v54 = vpop.permute.xlu0 %191 }
  0x90   :  { %v197_v61 = vpop.permute.xlu1 %196 }
  0x92   :  { %v95_v21 = vpop.f32.mrf.mxu3 }
  0x93   :  { %v96_v26 = vadd.f32 %v95_v21, %v52_v24 }
  0x95   :  { %v103_v33 = vmax.f32 %v96_v26, 0.0 }
  0x97   :  { %v220_v8 = vpop.permute.xlu0 %219 }
  0x98   :  { %v222_v10 = vperm.slane %v220_v8, 0 }
  0x9a   :  { %v98_v25 = vpop.f32.mrf.mxu3 }
  0x9b   :  { %v99_v27 = vadd.f32 %v98_v25, %v57_v20 }
  0x9d   :  { %v104_v30 = vmax.f32 %v99_v27, 0.0 }
  0x9f   :  { %158 = vmatpush.msra.mxu1 %v104_v30  ;;  %251 = vmatpush.msra.mxu2 %v104_v30 }
  0xa1   :  { %159 = vmatpush.msra.mxu1 %v103_v33  ;;  %252 = vmatpush.msra.mxu2 %v103_v33 }
  0xa3   :  { %160 = vmatpush.msra.mxu1 %v102_v35  ;;  %253 = vmatpush.msra.mxu2 %v102_v35 }
  0xa5   :  { %161 = vmatpush.msra.mxu1 %v101_v36  ;;  %254 = vmatpush.msra.mxu2 %v101_v36 }
  0xa6   :  { %245 = vmatmul.msk.f32.vlgmr.msra.gmra.mxu1 %vm133_vm1, %v105_v37  ;;  %247 = vmatmul.msk.f32.vlgmr.msra.gmra.mxu2 %vm133_vm1, %v107_v38 }
  0xae   :  { %246 = vmatmul.msk.f32.gmra.mxu1 %vm133_vm1, %v106_v39  ;;  %248 = vmatmul.msk.f32.gmra.mxu2 %vm133_vm1, %v108_v40 }
 0x123   :  { %v163_v43 = vpop.f32.mrf.mxu1 }
 0x124   :  { %v164_v45 = vadd.f32 %v163_v43, %v116_v41 }
 0x126   :  { %v175_v50 = vmax.f32 %v164_v45, 0.0 }
 0x128   :  { %v204_v55 = vmul.f32 %v187_v48, %v175_v50 }
 0x129   :  { %v169_v47 = vpop.f32.mrf.mxu2 }
 0x12a   :  { %v170_v51 = vadd.f32 %v169_v47, %v126_v44 }
 0x12b   :  { %v166_v49 = vpop.f32.mrf.mxu1 }
 0x12c   :  { %v167_v52 = vadd.f32 %v166_v49, %v121_v42  ;;  %v177_v56 = vmax.f32 %v170_v51, 0.0 }
 0x12e   :  { %v176_v53 = vmax.f32 %v167_v52, 0.0  ;;  %v206_v62 = vmul.f32 %v197_v61, %v177_v56 }
 0x130   :  { %v205_v57 = vmul.f32 %v192_v54, %v176_v53 }
 0x131   :  { %v172_v58 = vpop.f32.mrf.mxu2 }
 0x132   :  { %v208_v59 = vadd.f32 %v205_v57, %v204_v55  ;;  %v173_v60 = vadd.f32 %v172_v58, %v131_v46 }
 0x134   :  { %v178_v63 = vmax.f32 %v173_v60, 0.0  ;;  %v209_v2 = vadd.f32 %v208_v59, %v206_v62 }
 0x136   :  { %v207_v1 = vmul.f32 %v202_v0, %v178_v63 }
 0x138   :  { %v210_v3 = vadd.f32 %v209_v2, %v207_v1 }
 0x13a   :  { %v211_v4 = vrot.slane %v210_v3, 4 }
 0x13c   :  { %v212_v5 = vadd.f32 %v211_v4, %v210_v3 }
 0x13e   :  { %v213_v6 = vrot.slane %v212_v5, 2 }
 0x140   :  { %v214_v7 = vadd.f32 %v213_v6, %v212_v5 }
 0x142   :  { %v215_v9 = vrot.slane %v214_v7, 1 }
 0x144   :  { %v216_v11 = vadd.f32 %v215_v9, %v214_v7 }
 0x146   :  { %v223_v12 = vadd.f32 %v222_v10, %v216_v11 }
 0x148   :  { %224 = vst [vmem:[#allocation3] sm:$0x1] %v223_v12 }
 0x149   :  { %235 = dma.vmem_to_hbm [thread:$0]  %s231_s16, 16, %s233_s19, [#allocation4]  }
 0x14a   :  { %284 = dma.done.wait [#allocation4], 16  }
 0x14b   :  { %285 = vsyncadd [#allocation4], 4294967280 }
 0x14c   :  { %240 = vsyncpa [#allocation4], 1 }

</bundles_post_ra>
